<compile_context>
chip_gen: v6e
topology: v6e:2x2x1
jax: 0.10.0
libtpu: 0.0.40
codegen_flags: <defaults>
</compile_context>

<pallas_src>
import functools

import jax
import jax.numpy as jnp
from jax.experimental import pallas as pl
from jax.experimental.pallas import tpu as pltpu


# --------------------------------------------------------------------------
# Kernel
# --------------------------------------------------------------------------
def deepset_kernel(x_ref, w1_ref, b1_ref, w23_ref, b23_ref, w4_ref, b4_ref,
                   o_ref, *, set_size):
    # x_ref: (TB*S, Din) f32 tile; weights bf16; biases f32.
    TBS, _ = x_ref.shape
    H = w1_ref.shape[1]
    TB = TBS // set_size

    # --- phi layer 1: one flat MXU pass over all tile*S rows ---------------
    # Cast to bf16 in-kernel (VPU) so HBM only carries the f32 input once.
    x2d = x_ref[...].astype(w1_ref.dtype)
    h1 = jnp.dot(x2d, w1_ref[...], preferred_element_type=jnp.float32)
    h1 = jnp.maximum(h1 + b1_ref[...], 0.0)                 # f32 epilogue (v5e-safe)

    # --- deep-set sum over the set axis (pulled in front of W2) ------------
    # Pure sublane split when set_size % 8 == 0; perf-only concern otherwise.
    agg = jnp.sum(h1.reshape(TB, set_size, H), axis=1)      # (TB, H) f32

    # --- fused phi[2] + rho[0]: relu(agg @ (W2 W3) + ((S b2) W3 + b3)) -----
    r1 = jnp.maximum(
        jnp.dot(agg.astype(w23_ref.dtype), w23_ref[...],
                preferred_element_type=jnp.float32) + b23_ref[...], 0.0)

    # --- rho output Linear --------------------------------------------------
    out = jnp.dot(r1.astype(w4_ref.dtype), w4_ref[...],
                  preferred_element_type=jnp.float32) + b4_ref[...]

    o_ref[...] = out.astype(o_ref.dtype)


# --------------------------------------------------------------------------
# One-time parameter packing (cache the result; do NOT rebuild per forward)
# --------------------------------------------------------------------------
def pack_params(params, set_size, compute_dtype=jnp.bfloat16):
    f32 = jnp.float32
    w2 = params["w2"].astype(f32)
    w3 = params["w3"].astype(f32)
    # Fuse the two back-to-back Linears (no nonlinearity between them).
    w23 = w2 @ w3
    b23 = f32(set_size) * params["b2"].astype(f32) @ w3 + params["b3"].astype(f32)
    return {
        "w1": params["w1"].astype(compute_dtype),
        "b1": params["b1"].astype(f32).reshape(1, -1),
        "w23": w23.astype(compute_dtype),
        "b23": b23.reshape(1, -1).astype(f32),
        "w4": params["w4"].astype(compute_dtype),
        "b4": params["b4"].astype(f32).reshape(1, -1),
    }


# --------------------------------------------------------------------------
# Tiling
# --------------------------------------------------------------------------
def _is_multi_tc_chip():
    """v7x-style chips have 2 TensorCores; prefer >=2 grid steps there."""
    try:
        kind = jax.devices()[0].device_kind.lower()
        return "v7" in kind
    except Exception:
        return False


def _choose_batch_tile(B, S, Din, H, Dout, *, vmem_budget_bytes=40 << 20,
                       want_steps=1):
    """Largest divisor of B that (a) keeps output blocks sublane-aligned
    (tile % 8 == 0, or the full batch), (b) fits a conservative VMEM budget
    (sized for v7x's 64 MiB), and (c) leaves `want_steps` grid steps when
    possible (megacore sharding + DMA/compute overlap)."""
    # Invariant weight blocks (double-buffered by default).
    w_bytes = 2 * ((Din * H + H * H + H * Dout) * 2 + (3 * H + Dout) * 4)

    def vmem_est(tile):
        rows = tile * S
        inp = 2 * rows * Din * 4          # f32 input tile, double-buffered
        act = rows * H * 4                # f32 h1 intermediate
        out = 2 * tile * Dout * 4         # f32 output tile, double-buffered
        return inp + act + out + w_bytes

    divisors = [d for d in range(1, B + 1) if B % d == 0]
    aligned = [d for d in divisors if d % 8 == 0 or d == B]
    fitting = [d for d in aligned if vmem_est(d) <= vmem_budget_bytes]
    if not fitting:
        fitting = [min(aligned)]
    for steps in (want_steps, 2, 1):
        cands = [d for d in fitting if B // d >= steps]
        if cands:
            return max(cands)
    return max(fitting)


# --------------------------------------------------------------------------
# Wrapper
# --------------------------------------------------------------------------
def deepset_encoder(x, packed, *, batch_tile=None,
                    vmem_limit_bytes=48 * 1024 * 1024):
    """x: (B, S, Din) f32; packed: output of pack_params()."""
    B, S, Din = x.shape
    H = packed["w1"].shape[1]
    Dout = packed["w4"].shape[1]

    if batch_tile is None:
        want_steps = 4 if _is_multi_tc_chip() else 1
        batch_tile = _choose_batch_tile(B, S, Din, H, Dout,
                                        want_steps=want_steps)
    assert B % batch_tile == 0
    assert batch_tile % 8 == 0 or batch_tile == B
    grid = (B // batch_tile,)

    # Free metadata reshape in the wrapper; avoids an in-kernel input collapse.
    x2d = x.reshape(B * S, Din)

    def invariant(shape):
        # Constant-index blocks: DMA'd once, reused across grid steps.
        # TODO(synk): for very large H on v7x, add pipeline_mode=pl.Buffered(1)
        # to skip double-buffering these invariant weight blocks.
        return pl.BlockSpec(shape, lambda i: (0,) * len(shape))

    kernel = functools.partial(deepset_kernel, set_size=S)

    return pl.pallas_call(
        kernel,
        out_shape=jax.ShapeDtypeStruct((B, Dout), jnp.float32),
        grid_spec=pltpu.PrefetchScalarGridSpec(
            num_scalar_prefetch=0,
            grid=grid,
            in_specs=[
                pl.BlockSpec((batch_tile * S, Din), lambda i: (i, 0)),
                invariant(packed["w1"].shape), invariant(packed["b1"].shape),
                invariant(packed["w23"].shape), invariant(packed["b23"].shape),
                invariant(packed["w4"].shape), invariant(packed["b4"].shape),
            ],
            out_specs=pl.BlockSpec((batch_tile, Dout), lambda i: (i, 0)),
        ),
        compiler_params=pltpu.CompilerParams(
            dimension_semantics=("parallel",),
            vmem_limit_bytes=vmem_limit_bytes,
        ),
    )(x2d, packed["w1"], packed["b1"], packed["w23"], packed["b23"],
      packed["w4"], packed["b4"])


# --------------------------------------------------------------------------
# Reference + demo
# --------------------------------------------------------------------------
def init_params(key, ensemble_in_dim, hidden_channels, out_channels):
    ks = jax.random.split(key, 8)
    scale = 0.1
    return {
        "w1": scale * jax.random.normal(ks[0], (ensemble_in_dim, hidden_channels), jnp.float32),
        "b1": scale * jax.random.normal(ks[1], (1, hidden_channels), jnp.float32),
        "w2": scale * jax.random.normal(ks[2], (hidden_channels, hidden_channels), jnp.float32),
        "b2": scale * jax.random.normal(ks[3], (1, hidden_channels), jnp.float32),
        "w3": scale * jax.random.normal(ks[4], (hidden_channels, hidden_channels), jnp.float32),
        "b3": scale * jax.random.normal(ks[5], (1, hidden_channels), jnp.float32),
        "w4": scale * jax.random.normal(ks[6], (hidden_channels, out_channels), jnp.float32),
        "b4": scale * jax.random.normal(ks[7], (1, out_channels), jnp.float32),
    }


def deepset_reference(x, p):
    # Pure-JAX f32 reference with the original (per-element phi, then sum) order.
    h = jnp.maximum(jnp.einsum("bsd,dh->bsh", x, p["w1"]) + p["b1"], 0.0)
    phi = jnp.einsum("bsh,hk->bsk", h, p["w2"]) + p["b2"]
    agg = phi.sum(axis=1)
    r = jnp.maximum(agg @ p["w3"] + p["b3"][0], 0.0)
    return r @ p["w4"] + p["b4"][0]


if __name__ == "__main__":
    B, S = 16, 8                 # batch, set size
    ensemble_in_dim = 16
    hidden_channels = 32
    out_channels = 16

    key = jax.random.PRNGKey(0)
    kx, kp = jax.random.split(key)
    x = jax.random.normal(kx, (B, S, ensemble_in_dim), jnp.float32)
    params = init_params(kp, ensemble_in_dim, hidden_channels, out_channels)

    packed = pack_params(params, S)          # one-time weight prep (cacheable)
    out = deepset_encoder(x, packed)
    out = jax.block_until_ready(out)

    ref = deepset_reference(x, params)
    assert out.shape == (B, out_channels)
    # bf16 matmul operands (f32 accumulation) -> bf16-appropriate tolerance.
    max_diff = float(jnp.max(jnp.abs(out - ref)))
    assert jnp.allclose(out, ref, atol=5e-2, rtol=5e-2), (
        f"mismatch vs reference, max abs diff = {max_diff}")

    print("KERNEL_OK")
</pallas_src>

<mosaic_0001>
module attributes {stable_mosaic.version = 11 : i64} {
  func.func @deepset_kernel(%arg0: i32, %arg1: memref<128x16xf32, #tpu.memory_space<vmem>>, %arg2: memref<16x32xbf16, #tpu.memory_space<vmem>>, %arg3: memref<1x32xf32, #tpu.memory_space<vmem>>, %arg4: memref<32x32xbf16, #tpu.memory_space<vmem>>, %arg5: memref<1x32xf32, #tpu.memory_space<vmem>>, %arg6: memref<32x16xbf16, #tpu.memory_space<vmem>>, %arg7: memref<1x16xf32, #tpu.memory_space<vmem>>, %arg8: memref<16x16xf32, #tpu.memory_space<vmem>>) attributes {dimension_semantics = [#tpu.dimension_semantics<parallel>], iteration_bounds = array<i64: 1>, scalar_prefetch = 0 : i64, scratch_operands = 0 : i64, tpu.core_type = #tpu.core_type<tc>, window_params = [{transform_indices = @transform_0, window_bounds = array<i64: 128, 16>}, {pipeline_mode = #tpu.pipeline_mode<synchronous>, transform_indices = @transform_1, window_bounds = array<i64: 16, 32>}, {pipeline_mode = #tpu.pipeline_mode<synchronous>, transform_indices = @transform_2, window_bounds = array<i64: 1, 32>}, {pipeline_mode = #tpu.pipeline_mode<synchronous>, transform_indices = @transform_3, window_bounds = array<i64: 32, 32>}, {pipeline_mode = #tpu.pipeline_mode<synchronous>, transform_indices = @transform_4, window_bounds = array<i64: 1, 32>}, {pipeline_mode = #tpu.pipeline_mode<synchronous>, transform_indices = @transform_5, window_bounds = array<i64: 32, 16>}, {pipeline_mode = #tpu.pipeline_mode<synchronous>, transform_indices = @transform_6, window_bounds = array<i64: 1, 16>}, {transform_indices = @transform_7, window_bounds = array<i64: 16, 16>}]} {
    %c0 = arith.constant 0 : index
    %c0_0 = arith.constant 0 : index
    %0 = vector.load %arg1[%c0, %c0_0] : memref<128x16xf32, #tpu.memory_space<vmem>>, vector<128x16xf32>
    %1 = arith.truncf %0 : vector<128x16xf32> to vector<128x16xbf16>
    %c0_1 = arith.constant 0 : index
    %c0_2 = arith.constant 0 : index
    %2 = vector.load %arg2[%c0_1, %c0_2] : memref<16x32xbf16, #tpu.memory_space<vmem>>, vector<16x32xbf16>
    %cst = arith.constant dense<0.000000e+00> : vector<128x32xf32>
    %3 = tpu.matmul %1, %2, %cst {dimension_numbers = #tpu.dot_dimension_numbers<[1], [0], [0], [1], [0, 0, 1, 1], [], []>} : vector<128x16xbf16>, vector<16x32xbf16>, vector<128x32xf32> -> vector<128x32xf32>
    %c0_3 = arith.constant 0 : index
    %c0_4 = arith.constant 0 : index
    %4 = vector.load %arg3[%c0_3, %c0_4] : memref<1x32xf32, #tpu.memory_space<vmem>>, vector<1x32xf32>
    %5 = vector.broadcast %4 : vector<1x32xf32> to vector<128x32xf32>
    %6 = arith.addf %3, %5 : vector<128x32xf32>
    %cst_5 = arith.constant 0.000000e+00 : f32
    %7 = vector.broadcast %cst_5 : f32 to vector<128x32xf32>
    %8 = arith.maximumf %6, %7 : vector<128x32xf32>
    %9 = vector.shape_cast %8 : vector<128x32xf32> to vector<16x8x32xf32>
    %cst_6 = arith.constant dense<0.000000e+00> : vector<16x32xf32>
    %10 = vector.multi_reduction <add>, %9, %cst_6 [1] : vector<16x8x32xf32> to vector<16x32xf32>
    %11 = arith.truncf %10 : vector<16x32xf32> to vector<16x32xbf16>
    %c0_7 = arith.constant 0 : index
    %c0_8 = arith.constant 0 : index
    %12 = vector.load %arg4[%c0_7, %c0_8] : memref<32x32xbf16, #tpu.memory_space<vmem>>, vector<32x32xbf16>
    %cst_9 = arith.constant dense<0.000000e+00> : vector<16x32xf32>
    %13 = tpu.matmul %11, %12, %cst_9 {dimension_numbers = #tpu.dot_dimension_numbers<[1], [0], [0], [1], [0, 0, 1, 1], [], []>} : vector<16x32xbf16>, vector<32x32xbf16>, vector<16x32xf32> -> vector<16x32xf32>
    %c0_10 = arith.constant 0 : index
    %c0_11 = arith.constant 0 : index
    %14 = vector.load %arg5[%c0_10, %c0_11] : memref<1x32xf32, #tpu.memory_space<vmem>>, vector<1x32xf32>
    %15 = vector.broadcast %14 : vector<1x32xf32> to vector<16x32xf32>
    %16 = arith.addf %13, %15 : vector<16x32xf32>
    %cst_12 = arith.constant 0.000000e+00 : f32
    %17 = vector.broadcast %cst_12 : f32 to vector<16x32xf32>
    %18 = arith.maximumf %16, %17 : vector<16x32xf32>
    %19 = arith.truncf %18 : vector<16x32xf32> to vector<16x32xbf16>
    %c0_13 = arith.constant 0 : index
    %c0_14 = arith.constant 0 : index
    %20 = vector.load %arg6[%c0_13, %c0_14] : memref<32x16xbf16, #tpu.memory_space<vmem>>, vector<32x16xbf16>
    %cst_15 = arith.constant dense<0.000000e+00> : vector<16x16xf32>
    %21 = tpu.matmul %19, %20, %cst_15 {dimension_numbers = #tpu.dot_dimension_numbers<[1], [0], [0], [1], [0, 0, 1, 1], [], []>} : vector<16x32xbf16>, vector<32x16xbf16>, vector<16x16xf32> -> vector<16x16xf32>
    %c0_16 = arith.constant 0 : index
    %c0_17 = arith.constant 0 : index
    %22 = vector.load %arg7[%c0_16, %c0_17] : memref<1x16xf32, #tpu.memory_space<vmem>>, vector<1x16xf32>
    %23 = vector.broadcast %22 : vector<1x16xf32> to vector<16x16xf32>
    %24 = arith.addf %21, %23 : vector<16x16xf32>
    %c0_18 = arith.constant 0 : index
    %c0_19 = arith.constant 0 : index
    %25 = vector.load %arg8[%c0_18, %c0_19] : memref<16x16xf32, #tpu.memory_space<vmem>>, vector<16x16xf32>
    tpu.vector_store %arg8[%c0_18, %c0_19], %24 {strides = array<i32>} : memref<16x16xf32, #tpu.memory_space<vmem>>, vector<16x16xf32>,
    return
  }
  func.func @transform_0(%arg0: i32) -> (i32, i32) {
    %c0_i32 = arith.constant 0 : i32
    %c0_i32_0 = arith.constant 0 : i32
    return %arg0, %c0_i32 : i32, i32
  }
  func.func @transform_1(%arg0: i32) -> (i32, i32) {
    %c0_i32 = arith.constant 0 : i32
    %c0_i32_0 = arith.constant 0 : i32
    %c0_i32_1 = arith.constant 0 : i32
    return %c0_i32, %c0_i32_0 : i32, i32
  }
  func.func @transform_2(%arg0: i32) -> (i32, i32) {
    %c0_i32 = arith.constant 0 : i32
    %c0_i32_0 = arith.constant 0 : i32
    %c0_i32_1 = arith.constant 0 : i32
    return %c0_i32, %c0_i32_0 : i32, i32
  }
  func.func @transform_3(%arg0: i32) -> (i32, i32) {
    %c0_i32 = arith.constant 0 : i32
    %c0_i32_0 = arith.constant 0 : i32
    %c0_i32_1 = arith.constant 0 : i32
    return %c0_i32, %c0_i32_0 : i32, i32
  }
  func.func @transform_4(%arg0: i32) -> (i32, i32) {
    %c0_i32 = arith.constant 0 : i32
    %c0_i32_0 = arith.constant 0 : i32
    %c0_i32_1 = arith.constant 0 : i32
    return %c0_i32, %c0_i32_0 : i32, i32
  }
  func.func @transform_5(%arg0: i32) -> (i32, i32) {
    %c0_i32 = arith.constant 0 : i32
    %c0_i32_0 = arith.constant 0 : i32
    %c0_i32_1 = arith.constant 0 : i32
    return %c0_i32, %c0_i32_0 : i32, i32
  }
  func.func @transform_6(%arg0: i32) -> (i32, i32) {
    %c0_i32 = arith.constant 0 : i32
    %c0_i32_0 = arith.constant 0 : i32
    %c0_i32_1 = arith.constant 0 : i32
    return %c0_i32, %c0_i32_0 : i32, i32
  }
  func.func @transform_7(%arg0: i32) -> (i32, i32) {
    %c0_i32 = arith.constant 0 : i32
    %c0_i32_0 = arith.constant 0 : i32
    return %arg0, %c0_i32 : i32, i32
  }
}

</mosaic_0001>

<bundles_post_ra>
// kernel: tpu_custom_call.1
= control target key start
LH: loop header
LB: loop body
LE: loop exit
PB: predicated region body
PF: predicated region fallthrough
CT: control target
= control target key end

     0   :  { %vm67_vm0 = vcmask 130048   ;;  %s845_s0 = inlined_call_operand.vmem [shape: f32[128,16], index: 0, kind: input, shape index: {}]   ;;  %s846_s1 = inlined_call_operand.vmem [shape: bf16[16,32], index: 1, kind: input, shape index: {}]   ;;  %s847_s2 = inlined_call_operand.vmem [shape: f32[1,32], index: 2, kind: input, shape index: {}]   ;;  %s848_s3 = inlined_call_operand.vmem [shape: bf16[32,32], index: 3, kind: input, shape index: {}]   ;;  %s849_s4 = inlined_call_operand.vmem [shape: f32[1,32], index: 4, kind: input, shape index: {}]   ;;  %s850_s5 = inlined_call_operand.vmem [shape: bf16[32,16], index: 5, kind: input, shape index: {}]   ;;  %s851_s6 = inlined_call_operand.vmem [shape: f32[1,16], index: 6, kind: input, shape index: {}]   ;;  %s852_s7 = inlined_call_operand.hbm [shape: f32[16,16], index: 7, kind: output, shape index: {}]  }
   0x1   :  { %v617_v0 = vld [vmem:[%s846_s1] sm:$0xff]   ;;  %v29_v2 = vld [vmem:[%s845_s0 + $0x8] sm:$0xff]  ;;  %v30_v3 = vld [vmem:[%s845_s0 + $0x10] sm:$0xff] }
   0x2   :  { %v28_v1 = vld [vmem:[%s845_s0] sm:$0xff]  ;;  %576 = vmatprep.subr.bf16.mxu0 %v617_v0  ;;  %v31_v5 = vld [vmem:[%s845_s0 + $0x18] sm:$0xff]  ;;  %610 = vmatprep.subr.bf16.mxu1 %v617_v0  ;;  %v33_v7 = vld [vmem:[%s845_s0 + $0x28] sm:$0xff] }
   0x3   :  { %v44_v4 = vpack.c.bf16 %v29_v2, %v28_v1  ;;  %v32_v6 = vld [vmem:[%s845_s0 + $0x20] sm:$0xff]  ;;  %577 = vmatpush3.bf16.msra.mxu0 %v617_v0  ;;  %v45_v8 = vpack.c.bf16 %v31_v5, %v30_v3  ;;  %611 = vmatpush3.bf16.msra.mxu1 %v617_v0  ;;  %v41_v11 = vld [vmem:[%s845_s0 + $0x68] sm:$0xff]  ;;  %v42_v13 = vld [vmem:[%s845_s0 + $0x70] sm:$0xff] }
   0x4   :  { %v46_v9 = vpack.c.bf16 %v33_v7, %v32_v6  ;;  %v40_v10 = vld [vmem:[%s845_s0 + $0x60] sm:$0xff]  ;;  %v43_v14 = vld [vmem:[%s845_s0 + $0x78] sm:$0xff]  ;;  %v34_v15 = vld [vmem:[%s845_s0 + $0x30] sm:$0xff] }
   0x5   :  { %578 = vmatprep.mubr.msk.bf16.mxu0 %vm67_vm0, %v44_v4  ;;  %v50_v12 = vpack.c.bf16 %v41_v11, %v40_v10  ;;  %v35_v16 = vld [vmem:[%s845_s0 + $0x38] sm:$0xff]  ;;  %v51_v17 = vpack.c.bf16 %v43_v14, %v42_v13  ;;  %v36_v18 = vld [vmem:[%s845_s0 + $0x40] sm:$0xff]  ;;  %v37_v19 = vld [vmem:[%s845_s0 + $0x48] sm:$0xff] }
   0x6   :  { %579 = vmatmul.mubr.msk.bf16.vlgmr.msra.gmra.mxu0 %vm67_vm0, %v45_v8 }
   0x7   :  { %590 = vmatprep.mubr.msk.bf16.mxu1 %vm67_vm0, %v50_v12  ;;  %582 = vmatprep.mubr.msk.bf16.mxu0 %vm67_vm0, %v46_v9 }
   0x8   :  { %591 = vmatmul.mubr.msk.bf16.vlgmr.msra.gmra.mxu1 %vm67_vm0, %v51_v17 }
   0x9   :  { %12 = vsyncpa [#allocation3], 0  ;;  %v47_v20 = vpack.c.bf16 %v35_v16, %v34_v15  ;;  %v48_v21 = vpack.c.bf16 %v37_v19, %v36_v18  ;;  %v38_v22 = vld [vmem:[%s845_s0 + $0x50] sm:$0xff]  ;;  %v39_v23 = vld [vmem:[%s845_s0 + $0x58] sm:$0xff]  ;;  %v644_v26 = vmov 0.0   ;;  %vm645_vm1 = vmmov 0  }
   0xa   :  { %v49_v24 = vpack.c.bf16 %v39_v23, %v38_v22  ;;  %v618_v25 = vld [vmem:[%s848_s3 + $0x8] sm:$0xff]   ;;  %594 = vmatprep.subr.bf16.mxu1 %v644_v26  ;;  %v619_v27 = vld [vmem:[%s848_s3] sm:$0xff]   ;;  %598 = vmatprep.mubr.msk.bf16.mxu1 %vm645_vm1, %v644_v26  ;;  %vm205_vm2 = vcmask 261120   ;;  %vm377_vm3 = vcmask 1041409   ;;  %vm379_vm4 = vcmask 1042434  }
   0xb   :  { %595 = vmatpush3.bf16.msra.mxu1 %v618_v25  ;;  %v762_v28 = vld [vmem:[%s847_s2] ss:$0 sm:$0xff]  ;;  %vm381_vm5 = vcmask 1043459   ;;  %vm383_vm6 = vcmask 1044484   ;;  %vm385_vm7 = vcmask 1045509   ;;  %vm387_vm8 = vcmask 1046534  }
   0xc   :  { %596 = vmatprep.subr.bf16.mxu1 %v644_v26  ;;  %vm389_vm9 = vcmask 1047559  }
   0xe   :  { %583 = vmatmul.mubr.msk.bf16.gmra.mxu0 %vm67_vm0, %v47_v20 }
   0xf   :  { %586 = vmatprep.mubr.msk.bf16.mxu0 %vm67_vm0, %v48_v21  ;;  %597 = vmatpush3.bf16.msra.mxu1 %v619_v27 }
  0x10   :  { %602 = vmatprep.subr.bf16.mxu1 %v644_v26 }
  0x16   :  { %587 = vmatmul.mubr.msk.bf16.gmra.mxu0 %vm67_vm0, %v49_v24 }
  0xc6   :  { %v580_v29 = vpop.f32.mrf.mxu0 }
  0xc7   :  { %v135_v30 = vadd.f32 %v580_v29, %v762_v28 }
  0xc8   :  { %v126_v31 = vpop.f32.mrf.mxu0  ;;  %v592_v34 = vpop.f32.mrf.mxu1 }
  0xc9   :  { %v191_v32 = vmax.f32 %v135_v30, 0.0  ;;  %v127_v33 = vadd.f32 %v762_v28, %v126_v31  ;;  %v183_v38 = vadd.f32 %v592_v34, %v762_v28 }
  0xca   :  { %v581_v35 = vpop.f32.mrf.mxu0  ;;  %v174_v43 = vpop.f32.mrf.mxu1 }
  0xcb   :  { %v220_v36 = vsel %vm205_vm2, %v191_v32, 0.0  ;;  %v189_v37 = vmax.f32 %v127_v33, 0.0  ;;  %v138_v39 = vadd.f32 %v581_v35, %v762_v28  ;;  %v175_v45 = vadd.f32 %v762_v28, %v174_v43 }
  0xcc   :  { %v129_v40 = vpop.f32.mrf.mxu0  ;;  %v221_v41 = vrot.slane %v220_v36, 4  ;;  %v203_v48 = vmax.f32 %v183_v38, 0.0  ;;  %v593_v8 = vpop.f32.mrf.mxu1 }
  0xcd   :  { %v130_v42 = vadd.f32 %v762_v28, %v129_v40  ;;  %v206_v46 = vsel %vm205_vm2, %v189_v37, 0.0  ;;  %v192_v49 = vmax.f32 %v138_v39, 0.0  ;;  %v201_v55 = vmax.f32 %v175_v45, 0.0 }
  0xce   :  { %v584_v44 = vpop.f32.mrf.mxu0  ;;  %v222_v51 = vadd.f32 %v221_v41, %v220_v36  ;;  %v207_v53 = vrot.slane %v206_v46, 4  ;;  %v304_v57 = vsel %vm205_vm2, %v203_v48, 0.0  ;;  %v186_v17 = vadd.f32 %v593_v8, %v762_v28  ;;  %v177_v21 = vpop.f32.mrf.mxu1 }
  0xcf   :  { %v190_v47 = vmax.f32 %v130_v42, 0.0  ;;  %v227_v59 = vsel %vm205_vm2, %v192_v49, 0.0  ;;  %v151_v60 = vadd.f32 %v584_v44, %v762_v28  ;;  %v305_v63 = vrot.slane %v304_v57, 4 }
  0xd0   :  { %v142_v50 = vpop.f32.mrf.mxu0  ;;  %v223_v61 = vrot.slane %v222_v51, 2  ;;  %v208_v62 = vadd.f32 %v207_v53, %v206_v46  ;;  %v290_v1 = vsel %vm205_vm2, %v201_v55, 0.0  ;;  %v228_v2 = vrot.slane %v227_v59, 4 }
  0xd1   :  { %v213_v52 = vsel %vm205_vm2, %v190_v47, 0.0  ;;  %v143_v54 = vadd.f32 %v762_v28, %v142_v50  ;;  %v195_v5 = vmax.f32 %v151_v60, 0.0  ;;  %v291_v7 = vrot.slane %v290_v1, 4 }
  0xd2   :  { %v214_v56 = vrot.slane %v213_v52, 4  ;;  %v585_v58 = vpop.f32.mrf.mxu0  ;;  %v224_v6 = vadd.f32 %v223_v61, %v222_v51  ;;  %v209_v9 = vrot.slane %v208_v62, 2  ;;  %v306_v10 = vadd.f32 %v305_v63, %v304_v57 }
  0xd3   :  { %v193_v0 = vmax.f32 %v143_v54, 0.0  ;;  %v229_v12 = vadd.f32 %v228_v2, %v227_v59  ;;  %v248_v15 = vsel %vm205_vm2, %v195_v5, 0.0  ;;  %v154_v16 = vadd.f32 %v585_v58, %v762_v28 }
  0xd4   :  { %v215_v3 = vadd.f32 %v214_v56, %v213_v52  ;;  %v145_v4 = vpop.f32.mrf.mxu0  ;;  %v225_v18 = vrot.slane %v224_v6, 1  ;;  %v292_v20 = vadd.f32 %v291_v7, %v290_v1  ;;  %v210_v22 = vadd.f32 %v209_v9, %v208_v62 }
  0xd5   :  { %v234_v11 = vsel %vm205_vm2, %v193_v0, 0.0  ;;  %v307_v23 = vrot.slane %v306_v10, 2  ;;  %v230_v24 = vrot.slane %v229_v12, 2  ;;  %v249_v27 = vrot.slane %v248_v15, 4 }
  0xd6   :  { %v216_v13 = vrot.slane %v215_v3, 2  ;;  %v588_v14 = vpop.f32.mrf.mxu0  ;;  %v235_v19 = vrot.slane %v234_v11, 4  ;;  %v146_v29 = vadd.f32 %v762_v28, %v145_v4  ;;  %v196_v31 = vmax.f32 %v154_v16, 0.0 }
  0xd7   :  { %v204_v32 = vmax.f32 %v186_v17, 0.0  ;;  %v178_v33 = vadd.f32 %v762_v28, %v177_v21  ;;  %v784_v34 = vadd.f32 %v225_v18, %v224_v6  ;;  %v293_v36 = vrot.slane %v292_v20, 2 }
  0xd8   :  { %v217_v25 = vadd.f32 %v216_v13, %v215_v3  ;;  %v158_v30 = vpop.f32.mrf.mxu0  ;;  %v236_v35 = vadd.f32 %v235_v19, %v234_v11  ;;  %v194_v37 = vmax.f32 %v146_v29, 0.0  ;;  %v786_v38 = vadd.f32 %v307_v23, %v306_v10 }
  0xd9   :  { %v202_v39 = vmax.f32 %v178_v33, 0.0  ;;  %v167_v40 = vadd.f32 %v588_v14, %v762_v28  ;;  %v211_v41 = vrot.slane %v210_v22, 1  ;;  %v231_v42 = vadd.f32 %v230_v24, %v229_v12 }
  0xda   :  { %v218_v43 = vrot.slane %v217_v25, 1  ;;  %v250_v44 = vadd.f32 %v249_v27, %v248_v15  ;;  %v589_v45 = vpop.f32.mrf.mxu0  ;;  %v255_v46 = vsel %vm205_vm2, %v196_v31, 0.0  ;;  %v311_v47 = vsel %vm205_vm2, %v204_v32, 0.0 }
  0xdb   :  { %v241_v48 = vsel %vm205_vm2, %v194_v37, 0.0  ;;  %v297_v49 = vsel %vm205_vm2, %v202_v39, 0.0  ;;  %v320_v50 = vpack.c.bf16 %v784_v34, %v784_v34  ;;  %v237_v51 = vrot.slane %v236_v35, 2 }
  0xdc   :  { %v795_v52 = vadd.f32 %v293_v36, %v292_v20  ;;  %v242_v53 = vrot.slane %v241_v48, 4  ;;  %v298_v54 = vrot.slane %v297_v49, 4  ;;  %v199_v55 = vmax.f32 %v167_v40, 0.0  ;;  %v161_v62 = vpop.f32.mrf.mxu0 }
  0xdd   :  { %v159_v56 = vadd.f32 %v762_v28, %v158_v30  ;;  %v170_v57 = vadd.f32 %v589_v45, %v762_v28  ;;  %v219_v58 = vadd.f32 %v218_v43, %v217_v25  ;;  %v256_v59 = vrot.slane %v255_v46, 4 }
  0xde   :  { %v312_v60 = vrot.slane %v311_v47, 4  ;;  %v243_v61 = vadd.f32 %v242_v53, %v241_v48  ;;  %v212_v63 = vadd.f32 %v211_v41, %v210_v22  ;;  %v276_v0 = vsel %vm205_vm2, %v199_v55, 0.0 }
  0xdf   :  { %v197_v1 = vmax.f32 %v159_v56, 0.0  ;;  %v200_v2 = vmax.f32 %v170_v57, 0.0  ;;  %v232_v3 = vrot.slane %v231_v42, 1  ;;  %v238_v4 = vadd.f32 %v237_v51, %v236_v35 }
  0xe0   :  { %v244_v5 = vrot.slane %v243_v61, 2  ;;  %v277_v6 = vrot.slane %v276_v0, 4  ;;  %v299_v7 = vadd.f32 %v298_v54, %v297_v49  ;;  %v162_v10 = vadd.f32 %v762_v28, %v161_v62 }
  0xe1   :  { %v262_v8 = vsel %vm205_vm2, %v197_v1, 0.0  ;;  %v283_v9 = vsel %vm205_vm2, %v200_v2, 0.0  ;;  %v319_v11 = vpack.c.bf16 %v219_v58, %v219_v58  ;;  %v257_v12 = vadd.f32 %v256_v59, %v255_v46 }
  0xe2   :  { %v313_v13 = vadd.f32 %v312_v60, %v311_v47  ;;  %v278_v14 = vadd.f32 %v277_v6, %v276_v0  ;;  %v245_v15 = vadd.f32 %v244_v5, %v243_v61  ;;  %v263_v16 = vrot.slane %v262_v8, 4 }
  0xe3   :  { %v284_v17 = vrot.slane %v283_v9, 4  ;;  %v198_v18 = vmax.f32 %v162_v10, 0.0  ;;  %v318_v19 = vpack.c.bf16 %v212_v63, %v212_v63  ;;  %v251_v20 = vrot.slane %v250_v44, 2 }
  0xe4   :  { %v239_v21 = vrot.slane %v238_v4, 1  ;;  %v279_v22 = vrot.slane %v278_v14, 2  ;;  %v300_v23 = vrot.slane %v299_v7, 2  ;;  %v264_v24 = vadd.f32 %v263_v16, %v262_v8 }
  0xe5   :  { %v285_v25 = vadd.f32 %v284_v17, %v283_v9  ;;  %v269_v27 = vsel %vm205_vm2, %v198_v18, 0.0  ;;  %v362_v29 = vunpack.c.l.b16 %v319_v11  ;;  %v258_v28 = vrot.slane %v257_v12, 2 }
  0xe6   :  { %v314_v30 = vrot.slane %v313_v13, 2  ;;  %v280_v31 = vadd.f32 %v279_v22, %v278_v14  ;;  %v246_v32 = vrot.slane %v245_v15, 1  ;;  %v265_v33 = vrot.slane %v264_v24, 2 }
  0xe7   :  { %v286_v35 = vrot.slane %v285_v25, 2  ;;  %v270_v36 = vrot.slane %v269_v27, 4  ;;  %v361_v37 = vunpack.c.l.b16 %v318_v19  ;;  %v233_v39 = vadd.f32 %v232_v3, %v231_v42 }
  0xe8   :  { %v252_v40 = vadd.f32 %v251_v20, %v250_v44  ;;  %v240_v41 = vadd.f32 %v239_v21, %v238_v4  ;;  %v301_v43 = vadd.f32 %v300_v23, %v299_v7  ;;  %v266_v45 = vadd.f32 %v265_v33, %v264_v24 }
  0xe9   :  { %v287_v46 = vadd.f32 %v286_v35, %v285_v25  ;;  %v271_v47 = vadd.f32 %v270_v36, %v269_v27  ;;  %v378_v48 = vsel %vm377_vm3, %v362_v29, %v361_v37  ;;  %v259_v49 = vadd.f32 %v258_v28, %v257_v12 }
  0xea   :  { %v315_v51 = vadd.f32 %v314_v30, %v313_v13  ;;  %v281_v53 = vrot.slane %v280_v31, 1  ;;  %v247_v54 = vadd.f32 %v246_v32, %v245_v15  ;;  %v267_v55 = vrot.slane %v266_v45, 1 }
  0xeb   :  { %v288_v56 = vrot.slane %v287_v46, 1  ;;  %v272_v57 = vrot.slane %v271_v47, 2  ;;  %v363_v58 = vunpack.c.l.b16 %v320_v50  ;;  %v321_v42 = vpack.c.bf16 %v233_v39, %v233_v39 }
  0xec   :  { %v253_v44 = vrot.slane %v252_v40, 1  ;;  %v295_v59 = vrot.slane %v795_v52, 1  ;;  %v309_v60 = vrot.slane %v786_v38, 1  ;;  %v302_v61 = vrot.slane %v301_v43, 1 }
  0xed   :  { %v268_v62 = vadd.f32 %v267_v55, %v266_v45  ;;  %v273_v63 = vadd.f32 %v272_v57, %v271_v47  ;;  %v380_v0 = vsel %vm379_vm4, %v363_v58, %v378_v48  ;;  %v322_v1 = vpack.c.bf16 %v240_v41, %v240_v41  ;;  %v621_v55 = vld [vmem:[%s850_s5] sm:$0xff]  }
  0xee   :  { %v316_v2 = vrot.slane %v315_v51, 1  ;;  %v282_v3 = vadd.f32 %v281_v53, %v280_v31  ;;  %v260_v4 = vrot.slane %v259_v49, 1  ;;  %v323_v5 = vpack.c.bf16 %v247_v54, %v247_v54  ;;  %v620_v54 = vld [vmem:[%s850_s5 + $0x8] sm:$0xff]   ;;  %s646_s5 = smov [#allocation2]  }
  0xef   :  { %v289_v6 = vadd.f32 %v288_v56, %v287_v46  ;;  %v274_v7 = vrot.slane %v273_v63, 1  ;;  %v364_v34 = vunpack.c.l.b16 %v321_v42  ;;  %v254_v50 = vadd.f32 %v253_v44, %v252_v40  ;;  %v553_v56 = vld [vmem:[%s849_s4] ss:$0 sm:$0xff]  ;;  %s532_s21 = sshll.u32 %s646_s5, 4  ;;  %s533_s21 = int_to_ptr.vmem [resolvable:$true] %s532_s21 }
  0xf0   :  { %v296_v8 = vadd.f32 %v295_v59, %v795_v52  ;;  %v310_v9 = vadd.f32 %v309_v60, %v786_v38  ;;  %v303_v10 = vadd.f32 %v302_v61, %v301_v43  ;;  %v326_v11 = vpack.c.bf16 %v268_v62, %v268_v62  ;;  %s622_s4 = scalar_lea.vmem %s533_s21, 256  ;;  %p627_p1 = scmp.lt.s32.totalorder %s533_s21, %s533_s21 }
  0xf1   :  { %v275_v12 = vadd.f32 %v274_v7, %v273_v63  ;;  %v365_v13 = vunpack.c.l.b16 %v322_v1  ;;  %v382_v14 = vsel %vm381_vm5, %v364_v34, %v380_v0  ;;  %v317_v15 = vadd.f32 %v316_v2, %v315_v51  ;;  %p623_p0 = scmp.ne.s32.totalorder %s533_s21, %s622_s4  ;;  %p628_p2 = scmp.lt.s32.totalorder %s622_s4, %s622_s4 }
  0xf2   :  { %v328_v16 = vpack.c.bf16 %v282_v3, %v282_v3  ;;  %v261_v17 = vadd.f32 %v260_v4, %v259_v49  ;;  %v366_v18 = vunpack.c.l.b16 %v323_v5  ;;  %v329_v19 = vpack.c.bf16 %v289_v6, %v289_v6 }
  0xf3   :  { %v327_v20 = vpack.c.bf16 %v275_v12, %v275_v12  ;;  %v324_v21 = vpack.c.bf16 %v254_v50, %v254_v50  ;;  %v330_v22 = vpack.c.bf16 %v296_v8, %v296_v8  ;;  %v331_v23 = vpack.c.bf16 %v303_v10, %v303_v10  ;;  %p629_p3 = por %p628_p2, %p627_p1 }
  0xf4   :  { %v369_v24 = vunpack.c.l.b16 %v326_v11  ;;  %v332_v38 = vpack.c.bf16 %v310_v9, %v310_v9  ;;  %v384_v25 = vsel %vm383_vm6, %v365_v13, %v382_v14  ;;  %v333_v27 = vpack.c.bf16 %v317_v15, %v317_v15 }
  0xf5   :  { %v370_v52 = vunpack.c.l.b16 %v327_v20  ;;  %v371_v29 = vunpack.c.l.b16 %v328_v16  ;;  %v325_v28 = vpack.c.bf16 %v261_v17, %v261_v17  ;;  %v386_v30 = vsel %vm385_vm7, %v366_v18, %v384_v25  ;;  %p630_p4 = pnand %p629_p3, %p623_p0 }
  0xf6   :  { %v372_v31 = vunpack.c.l.b16 %v329_v19  ;;  %v367_v33 = vunpack.c.l.b16 %v324_v21  ;;  %v373_v35 = vunpack.c.l.b16 %v330_v22  ;;  %v374_v37 = vunpack.c.l.b16 %v331_v23 }
  0xf7   :  { %v391_v32 = vsel %vm377_vm3, %v370_v52, %v369_v24  ;;  %v375_v40 = vunpack.c.l.b16 %v332_v38  ;;  %v368_v45 = vunpack.c.l.b16 %v325_v28  ;;  %v376_v46 = vunpack.c.l.b16 %v333_v27 }
  0xf8   :  { %v392_v36 = vsel %vm379_vm4, %v371_v29, %v391_v32  ;;  %v388_v41 = vsel %vm387_vm8, %v367_v33, %v386_v30 }
  0xf9   :  { %v393_v39 = vsel %vm381_vm5, %v372_v31, %v392_v36  ;;  %v390_v49 = vsel %vm389_vm9, %v368_v45, %v388_v41 }
  0xfa   :  { %v394_v43 = vsel %vm383_vm6, %v373_v35, %v393_v39 }
  0xfb   :  { %v395_v47 = vsel %vm385_vm7, %v374_v37, %v394_v43 }
  0xfc   :  { %v396_v48 = vsel %vm387_vm8, %v375_v40, %v395_v47 }
  0xfd   :  { %v397_v51 = vsel %vm389_vm9, %v376_v46, %v396_v48 }
  0xfe   :  { %v398_v53 = vpack.c.b16 %v397_v51, %v390_v49 }
 0x100   :  { %599 = vmatmul.mubr.msk.bf16.vlgmr.msra.gmra.mxu1 %vm205_vm2, %v398_v53 }
 0x101   :  { %606 = vmatprep.mubr.msk.bf16.mxu1 %vm645_vm1, %v644_v26  ;;  %603 = vmatpush3.bf16.msra.mxu1 %v620_v54 }
 0x102   :  { %604 = vmatprep.subr.bf16.mxu1 %v644_v26  ;;  %v557_v26 = vld [vmem:[%s851_s6] ss:$0 sm:$0xff] }
 0x105   :  { %605 = vmatpush3.bf16.msra.mxu1 %v621_v55 }
 0x1c0   :  { %v448_v57 = vpop.f32.mrf.mxu1 }
 0x1c1   :  { %v449_v42 = vadd.f32 %v553_v56, %v448_v57 }
 0x1c2   :  { %v600_v58 = vpop.f32.mrf.mxu1 }
 0x1c3   :  { %v455_v61 = vmax.f32 %v449_v42, 0.0 }
 0x1c4   :  { %v451_v44 = vpop.f32.mrf.mxu1 }
 0x1c5   :  { %v452_v59 = vadd.f32 %v553_v56, %v451_v44 }
 0x1c6   :  { %v601_v60 = vpop.f32.mrf.mxu1 }
 0x1c7   :  { %v456_v62 = vmax.f32 %v452_v59, 0.0 }
 0x1c9   :  { %v457_v63 = vpack.c.bf16 %v456_v62, %v455_v61 }
 0x1cb   :  { %607 = vmatmul.mubr.msk.bf16.vlgmr.msra.gmra.mxu1 %vm205_vm2, %v457_v63 }
 0x28b   :  { %v518_v0 = vpop.f32.mrf.mxu1 }
 0x28c   :  { %v519_v1 = vadd.f32 %v557_v26, %v518_v0 }
 0x28d   :  { %v608_v2 = vpop.f32.mrf.mxu1 }
 0x28e   :  { %525 = vst.msk [vmem:[#allocation2] sm:$0xff] %vm67_vm0, %v519_v1 }
 0x28f   :  { %v521_v3 = vpop.f32.mrf.mxu1 }
 0x290   :  { %v522_v4 = vadd.f32 %v557_v26, %v521_v3 }
 0x291   :  { %v609_v5 = vpop.f32.mrf.mxu1 }
 0x292   :  { %526 = vst.msk [vmem:[#allocation2 + $0x8] sm:$0xff] %vm67_vm0, %v522_v4 }
 0x293   :  { %633 = shalt.err (!%p630_p4)
}
 0x294   :  { %s647_s6 = smov 128   ;;  %s648_s22 = smov 8  }
 0x295   :  { %538 = dma.vmem_to_hbm [thread:$0]  %s533_s21, 256, %s852_s7, [#allocation3], %s647_s6, %s647_s6, %s648_s22  }
 0x296   :  { %642 = dma.done.wait [#allocation3], 256  }
 0x297   :  { %643 = vsyncadd [#allocation3], 4294967040 }
 0x298   :  { %542 = vsyncpa [#allocation3], 1 }

</bundles_post_ra>
